<compile_context>
chip_gen: v7x
topology: tpu7x:2x2x1
jax: 0.10.0
libtpu: 0.0.40
codegen_flags: <defaults>
</compile_context>

<pallas_src>
import jax
import jax.numpy as jnp
from jax import lax
from jax.experimental import pallas as pl
from jax.experimental.pallas import tpu as pltpu

# ---- model config (small, consistent with the module's __init__) ----
EMBED_DIM = 32
NHEAD = 4
HEAD_DIM = EMBED_DIM // NHEAD
FFN_DIM = 64
SEQ = 8
BATCH = 2
EPS = 1e-5
LANES = 128   # EMBED_DIM + FFN_DIM + EMBED_DIM == 128 (lane-dense packing)


def _layer_norm(x, gamma, beta):
    mean = jnp.mean(x, axis=-1, keepdims=True)
    var = jnp.mean((x - mean) ** 2, axis=-1, keepdims=True)
    return (x - mean) * lax.rsqrt(var + EPS) * gamma + beta


def encoder_layer_kernel(src_ref, pos_ref, w_qkv_ref, w_misc_ref, vec_ref, out_ref):
    """One grid step == one batch element: (L, E) rows, unmasked attention.

    Packed operand layout (built once in pack_params):
      w_qkv_ref : (E, 128)   = [Wq^T * scale | Wk^T | Wv^T | 0]
      w_misc_ref: (64, 128)  = [Wo^T (32x32) | W1^T (32x64) | W2^T (64x32)]
      vec_ref   : (8, 128)   rows = [bq*scale|bk|bv, bo, b1, b2, g1, be1, g2, be2]
    """
    f32 = jnp.float32
    E, F, HD, L = EMBED_DIM, FFN_DIM, HEAD_DIM, SEQ

    src = src_ref[...].astype(f32)          # (L, E)
    pos = pos_ref[...].astype(f32)          # (L, E)
    wm = w_misc_ref[...]                    # (64, 128)
    vec = vec_ref[...]                      # (8, 128)

    # ---- fused QKV projection: one wide matmul, N = 128 lanes ----
    # rows 0:L use src+pos (Q, K);  rows L:2L use src (V).
    xin = jnp.concatenate([src + pos, src], axis=0)                     # (2L, E)
    qkv = jnp.dot(xin, w_qkv_ref[...], preferred_element_type=f32)      # (2L, 128)
    qkv = qkv + vec[0:1, :]                                             # + [bq*s|bk|bv|0]

    # ---- per-head attention (static loop, NHEAD = 4), no mask needed ----
    ctx_heads = []
    for h in range(NHEAD):
        lo = h * HD
        qh = qkv[0:L, lo:lo + HD]                          # (L, HD), already scaled
        kh = qkv[0:L, E + lo:E + lo + HD]                  # (L, HD)
        vh = qkv[L:2 * L, 2 * E + lo:2 * E + lo + HD]      # (L, HD)
        # 'qd,kd->qk' directly on the MXU — no explicit kh.T.
        s = lax.dot_general(qh, kh, (((1,), (1,)), ((), ())),
                            preferred_element_type=f32)                 # (L, L)
        s = s - jnp.max(s, axis=-1, keepdims=True)
        p = jnp.exp(s)
        d = jnp.sum(p, axis=-1, keepdims=True)
        # EUP vrcp + one Newton step recovers full f32 accuracy (err ~ 6e-8).
        r = pl.reciprocal(d, approx=True)
        r = r * (2.0 - d * r)
        p = p * r
        ctx_heads.append(jnp.dot(p, vh, preferred_element_type=f32))    # (L, HD)

    # single output projection: concat heads (lane concat) then one K=32 matmul
    ctx = jnp.concatenate(ctx_heads, axis=-1)                           # (L, E)
    attn = jnp.dot(ctx, wm[0:E, 0:E], preferred_element_type=f32) + vec[1:2, 0:E]

    # residual + LayerNorm 1   (dropout == identity)
    x = _layer_norm(src + attn, vec[4:5, 0:E], vec[5:6, 0:E])

    # feed-forward: linear1 -> relu -> linear2   (dropout == identity)
    h1 = jnp.dot(x, wm[0:E, E:E + F], preferred_element_type=f32) + vec[2:3, 0:F]
    h1 = jnp.maximum(h1, 0.0)
    h2 = jnp.dot(h1, wm[:, E + F:E + F + E], preferred_element_type=f32) + vec[3:4, 0:E]

    # residual + LayerNorm 2
    y = _layer_norm(x + h2, vec[6:7, 0:E], vec[7:8, 0:E])

    out_ref[...] = y.astype(out_ref.dtype)


def pack_params(p):
    """Pack the 16 PyTorch-convention parameters into 3 lane-dense slabs.

    The softmax scale 1/sqrt(HEAD_DIM) is folded into Wq / bq here, so the
    kernel never multiplies the score matrix by it.
    """
    E, F = EMBED_DIM, FFN_DIM
    f32 = jnp.float32
    scale = 1.0 / (HEAD_DIM ** 0.5)

    w_qkv = jnp.zeros((E, LANES), f32)                       # (32, 128)
    w_qkv = w_qkv.at[:, 0:E].set(p["wq"].T.astype(f32) * scale)
    w_qkv = w_qkv.at[:, E:2 * E].set(p["wk"].T.astype(f32))
    w_qkv = w_qkv.at[:, 2 * E:3 * E].set(p["wv"].T.astype(f32))

    w_misc = jnp.zeros((max(E, F), LANES), f32)              # (64, 128)
    w_misc = w_misc.at[0:E, 0:E].set(p["wo"].T.astype(f32))
    w_misc = w_misc.at[0:E, E:E + F].set(p["w1"].T.astype(f32))
    w_misc = w_misc.at[0:F, E + F:E + F + E].set(p["w2"].T.astype(f32))

    vecs = jnp.zeros((8, LANES), f32)                        # (8, 128) = one f32 tile
    vecs = vecs.at[0, 0:E].set(p["bq"] * scale)
    vecs = vecs.at[0, E:2 * E].set(p["bk"])
    vecs = vecs.at[0, 2 * E:3 * E].set(p["bv"])
    vecs = vecs.at[1, 0:E].set(p["bo"])
    vecs = vecs.at[2, 0:F].set(p["b1"])
    vecs = vecs.at[3, 0:E].set(p["b2"])
    vecs = vecs.at[4, 0:E].set(p["g1"])
    vecs = vecs.at[5, 0:E].set(p["be1"])
    vecs = vecs.at[6, 0:E].set(p["g2"])
    vecs = vecs.at[7, 0:E].set(p["be2"])
    return {"w_qkv": w_qkv, "w_misc": w_misc, "vecs": vecs}


def transformer_encoder_layer(src, pos, packed):
    """src: (B, L, E) f32.  pos: (L, E) f32 (shared across batch).  -> (B, L, E)."""
    B, L, E = src.shape

    out = pl.pallas_call(
        encoder_layer_kernel,
        out_shape=jax.ShapeDtypeStruct((B, L, E), src.dtype),
        grid=(B,),                                           # one step per batch element
        in_specs=[
            # src: one (L, E) sequence per grid step (leading batch dim squeezed)
            pl.BlockSpec((None, L, E), lambda b: (b, 0, 0)),
            # pos: natural (L, E) shape, same block every step (stays VMEM-resident)
            pl.BlockSpec((L, E), lambda b: (0, 0)),
            # packed weight slabs: constant index_map -> fetched once per call
            pl.BlockSpec((EMBED_DIM, LANES), lambda b: (0, 0)),
            pl.BlockSpec((max(EMBED_DIM, FFN_DIM), LANES), lambda b: (0, 0)),
            pl.BlockSpec((8, LANES), lambda b: (0, 0)),
        ],
        out_specs=pl.BlockSpec((None, L, E), lambda b: (b, 0, 0)),
        compiler_params=pltpu.CompilerParams(
            dimension_semantics=("parallel",)),              # megacore-shardable on v7x
    )(src, pos, packed["w_qkv"], packed["w_misc"], packed["vecs"])
    return out


# ------------------------- pure-JAX reference -------------------------
def reference(src, pos, p):
    qk = src + pos[None, :, :]
    q = qk @ p["wq"].T + p["bq"]
    k = qk @ p["wk"].T + p["bk"]
    v = src @ p["wv"].T + p["bv"]

    B, L, E = src.shape

    def split(x):  # (B, L, E) -> (B, H, L, hd)
        return x.reshape(B, L, NHEAD, HEAD_DIM).transpose(0, 2, 1, 3)

    qh, kh, vh = split(q), split(k), split(v)
    scores = jnp.einsum("bhqd,bhkd->bhqk", qh, kh) / (HEAD_DIM ** 0.5)
    attn = jax.nn.softmax(scores, axis=-1)
    ctx = jnp.einsum("bhqk,bhkd->bhqd", attn, vh)
    ctx = ctx.transpose(0, 2, 1, 3).reshape(B, L, E)
    ctx = ctx @ p["wo"].T + p["bo"]

    x = _layer_norm(src + ctx, p["g1"], p["be1"])
    h = jnp.maximum(x @ p["w1"].T + p["b1"], 0.0)
    h = h @ p["w2"].T + p["b2"]
    return _layer_norm(x + h, p["g2"], p["be2"])


def init_params(key):
    E, F = EMBED_DIM, FFN_DIM
    ks = jax.random.split(key, 16)
    n = lambda k, shp, s=0.02: (s * jax.random.normal(k, shp)).astype(jnp.float32)
    return {
        "wq": n(ks[0], (E, E)), "wk": n(ks[1], (E, E)), "wv": n(ks[2], (E, E)),
        "bq": n(ks[3], (E,)), "bk": n(ks[4], (E,)), "bv": n(ks[5], (E,)),
        "wo": n(ks[6], (E, E)), "bo": n(ks[7], (E,)),
        "w1": n(ks[8], (F, E)), "b1": n(ks[9], (F,)),
        "w2": n(ks[10], (E, F)), "b2": n(ks[11], (E,)),
        "g1": jnp.ones((E,), jnp.float32) + n(ks[12], (E,)),
        "be1": n(ks[13], (E,)),
        "g2": jnp.ones((E,), jnp.float32) + n(ks[14], (E,)),
        "be2": n(ks[15], (E,)),
    }


if __name__ == "__main__":
    key = jax.random.PRNGKey(0)
    k_src, k_pos, k_par = jax.random.split(key, 3)
    src = jax.random.normal(k_src, (BATCH, SEQ, EMBED_DIM), jnp.float32)
    pos = jax.random.normal(k_pos, (SEQ, EMBED_DIM), jnp.float32)   # natural (L, E)
    params = init_params(k_par)
    packed = pack_params(params)           # one-time parameter packing

    out = transformer_encoder_layer(src, pos, packed)
    out = jax.block_until_ready(out)

    ref = reference(src, pos, params)
    assert out.shape == (BATCH, SEQ, EMBED_DIM)
    assert jnp.allclose(out, ref, rtol=1e-4, atol=1e-4), "mismatch vs reference"

    print("KERNEL_OK")
</pallas_src>

<mosaic_0001>
module attributes {stable_mosaic.version = 11 : i64} {
  func.func @encoder_layer_kernel(%arg0: i32, %arg1: memref<1x8x32xf32, #tpu.memory_space<vmem>>, %arg2: memref<8x32xf32, #tpu.memory_space<vmem>>, %arg3: memref<32x128xf32, #tpu.memory_space<vmem>>, %arg4: memref<64x128xf32, #tpu.memory_space<vmem>>, %arg5: memref<8x128xf32, #tpu.memory_space<vmem>>, %arg6: memref<1x8x32xf32, #tpu.memory_space<vmem>>) attributes {dimension_semantics = [#tpu.dimension_semantics<parallel>], iteration_bounds = array<i64: 2>, scalar_prefetch = 0 : i64, scratch_operands = 0 : i64, tpu.core_type = #tpu.core_type<tc>, window_params = [{transform_indices = @transform_0, window_bounds = array<i64: 1, 8, 32>}, {pipeline_mode = #tpu.pipeline_mode<synchronous>, transform_indices = @transform_1, window_bounds = array<i64: 8, 32>}, {pipeline_mode = #tpu.pipeline_mode<synchronous>, transform_indices = @transform_2, window_bounds = array<i64: 32, 128>}, {pipeline_mode = #tpu.pipeline_mode<synchronous>, transform_indices = @transform_3, window_bounds = array<i64: 64, 128>}, {pipeline_mode = #tpu.pipeline_mode<synchronous>, transform_indices = @transform_4, window_bounds = array<i64: 8, 128>}, {transform_indices = @transform_5, window_bounds = array<i64: 1, 8, 32>}]} {
    %c0 = arith.constant 0 : index
    %c0_0 = arith.constant 0 : index
    %c0_1 = arith.constant 0 : index
    %0 = vector.load %arg1[%c0, %c0_0, %c0_1] : memref<1x8x32xf32, #tpu.memory_space<vmem>>, vector<1x8x32xf32>
    %1 = vector.shape_cast %0 : vector<1x8x32xf32> to vector<8x32xf32>
    %c0_2 = arith.constant 0 : index
    %c0_3 = arith.constant 0 : index
    %2 = vector.load %arg2[%c0_2, %c0_3] : memref<8x32xf32, #tpu.memory_space<vmem>>, vector<8x32xf32>
    %c0_4 = arith.constant 0 : index
    %c0_5 = arith.constant 0 : index
    %3 = vector.load %arg4[%c0_4, %c0_5] : memref<64x128xf32, #tpu.memory_space<vmem>>, vector<64x128xf32>
    %c0_6 = arith.constant 0 : index
    %c0_7 = arith.constant 0 : index
    %4 = vector.load %arg5[%c0_6, %c0_7] : memref<8x128xf32, #tpu.memory_space<vmem>>, vector<8x128xf32>
    %5 = arith.addf %1, %2 : vector<8x32xf32>
    %6 = tpu.concatenate %5, %1 in 0 : vector<8x32xf32>, vector<8x32xf32> -> vector<16x32xf32>
    %c0_8 = arith.constant 0 : index
    %c0_9 = arith.constant 0 : index
    %7 = vector.load %arg3[%c0_8, %c0_9] : memref<32x128xf32, #tpu.memory_space<vmem>>, vector<32x128xf32>
    %cst = arith.constant dense<0.000000e+00> : vector<16x128xf32>
    %8 = tpu.matmul %6, %7, %cst {dimension_numbers = #tpu.dot_dimension_numbers<[1], [0], [0], [1], [0, 0, 1, 1], [], []>} : vector<16x32xf32>, vector<32x128xf32>, vector<16x128xf32> -> vector<16x128xf32>
    %9 = vector.extract_strided_slice %4 {offsets = [0, 0], sizes = [1, 128], strides = [1, 1]} : vector<8x128xf32> to vector<1x128xf32>
    %10 = vector.broadcast %9 : vector<1x128xf32> to vector<16x128xf32>
    %11 = arith.addf %8, %10 : vector<16x128xf32>
    %12 = vector.extract_strided_slice %11 {offsets = [0, 0], sizes = [8, 8], strides = [1, 1]} : vector<16x128xf32> to vector<8x8xf32>
    %13 = vector.extract_strided_slice %11 {offsets = [0, 32], sizes = [8, 8], strides = [1, 1]} : vector<16x128xf32> to vector<8x8xf32>
    %14 = vector.extract_strided_slice %11 {offsets = [8, 64], sizes = [8, 8], strides = [1, 1]} : vector<16x128xf32> to vector<8x8xf32>
    %cst_10 = arith.constant dense<0.000000e+00> : vector<8x8xf32>
    %15 = tpu.matmul %12, %13, %cst_10 {dimension_numbers = #tpu.dot_dimension_numbers<[1], [1], [0], [0], [0, 0, 1, 0], [], []>} : vector<8x8xf32>, vector<8x8xf32>, vector<8x8xf32> -> vector<8x8xf32>
    %cst_11 = arith.constant dense<0xFF800000> : vector<8xf32>
    %16 = vector.multi_reduction <maximumf>, %15, %cst_11 [1] : vector<8x8xf32> to vector<8xf32>
    %17 = vector.shape_cast %16 : vector<8xf32> to vector<8x1xf32>
    %18 = vector.broadcast %17 : vector<8x1xf32> to vector<8x8xf32>
    %19 = arith.subf %15, %18 : vector<8x8xf32>
    %20 = math.exp %19 : vector<8x8xf32>
    %cst_12 = arith.constant dense<0.000000e+00> : vector<8xf32>
    %21 = vector.multi_reduction <add>, %20, %cst_12 [1] : vector<8x8xf32> to vector<8xf32>
    %22 = vector.shape_cast %21 : vector<8xf32> to vector<8x1xf32>
    %23 = tpu.reciprocal %22 {approx = true} : vector<8x1xf32> -> vector<8x1xf32>
    %24 = arith.mulf %22, %23 : vector<8x1xf32>
    %cst_13 = arith.constant 2.000000e+00 : f32
    %25 = vector.broadcast %cst_13 : f32 to vector<8x1xf32>
    %26 = arith.subf %25, %24 : vector<8x1xf32>
    %27 = arith.mulf %23, %26 : vector<8x1xf32>
    %28 = vector.broadcast %27 : vector<8x1xf32> to vector<8x8xf32>
    %29 = arith.mulf %20, %28 : vector<8x8xf32>
    %cst_14 = arith.constant dense<0.000000e+00> : vector<8x8xf32>
    %30 = tpu.matmul %29, %14, %cst_14 {dimension_numbers = #tpu.dot_dimension_numbers<[1], [0], [0], [1], [0, 0, 1, 1], [], []>} : vector<8x8xf32>, vector<8x8xf32>, vector<8x8xf32> -> vector<8x8xf32>
    %31 = vector.extract_strided_slice %11 {offsets = [0, 8], sizes = [8, 8], strides = [1, 1]} : vector<16x128xf32> to vector<8x8xf32>
    %32 = vector.extract_strided_slice %11 {offsets = [0, 40], sizes = [8, 8], strides = [1, 1]} : vector<16x128xf32> to vector<8x8xf32>
    %33 = vector.extract_strided_slice %11 {offsets = [8, 72], sizes = [8, 8], strides = [1, 1]} : vector<16x128xf32> to vector<8x8xf32>
    %cst_15 = arith.constant dense<0.000000e+00> : vector<8x8xf32>
    %34 = tpu.matmul %31, %32, %cst_15 {dimension_numbers = #tpu.dot_dimension_numbers<[1], [1], [0], [0], [0, 0, 1, 0], [], []>} : vector<8x8xf32>, vector<8x8xf32>, vector<8x8xf32> -> vector<8x8xf32>
    %cst_16 = arith.constant dense<0xFF800000> : vector<8xf32>
    %35 = vector.multi_reduction <maximumf>, %34, %cst_16 [1] : vector<8x8xf32> to vector<8xf32>
    %36 = vector.shape_cast %35 : vector<8xf32> to vector<8x1xf32>
    %37 = vector.broadcast %36 : vector<8x1xf32> to vector<8x8xf32>
    %38 = arith.subf %34, %37 : vector<8x8xf32>
    %39 = math.exp %38 : vector<8x8xf32>
    %cst_17 = arith.constant dense<0.000000e+00> : vector<8xf32>
    %40 = vector.multi_reduction <add>, %39, %cst_17 [1] : vector<8x8xf32> to vector<8xf32>
    %41 = vector.shape_cast %40 : vector<8xf32> to vector<8x1xf32>
    %42 = tpu.reciprocal %41 {approx = true} : vector<8x1xf32> -> vector<8x1xf32>
    %43 = arith.mulf %41, %42 : vector<8x1xf32>
    %cst_18 = arith.constant 2.000000e+00 : f32
    %44 = vector.broadcast %cst_18 : f32 to vector<8x1xf32>
    %45 = arith.subf %44, %43 : vector<8x1xf32>
    %46 = arith.mulf %42, %45 : vector<8x1xf32>
    %47 = vector.broadcast %46 : vector<8x1xf32> to vector<8x8xf32>
    %48 = arith.mulf %39, %47 : vector<8x8xf32>
    %cst_19 = arith.constant dense<0.000000e+00> : vector<8x8xf32>
    %49 = tpu.matmul %48, %33, %cst_19 {dimension_numbers = #tpu.dot_dimension_numbers<[1], [0], [0], [1], [0, 0, 1, 1], [], []>} : vector<8x8xf32>, vector<8x8xf32>, vector<8x8xf32> -> vector<8x8xf32>
    %50 = vector.extract_strided_slice %11 {offsets = [0, 16], sizes = [8, 8], strides = [1, 1]} : vector<16x128xf32> to vector<8x8xf32>
    %51 = vector.extract_strided_slice %11 {offsets = [0, 48], sizes = [8, 8], strides = [1, 1]} : vector<16x128xf32> to vector<8x8xf32>
    %52 = vector.extract_strided_slice %11 {offsets = [8, 80], sizes = [8, 8], strides = [1, 1]} : vector<16x128xf32> to vector<8x8xf32>
    %cst_20 = arith.constant dense<0.000000e+00> : vector<8x8xf32>
    %53 = tpu.matmul %50, %51, %cst_20 {dimension_numbers = #tpu.dot_dimension_numbers<[1], [1], [0], [0], [0, 0, 1, 0], [], []>} : vector<8x8xf32>, vector<8x8xf32>, vector<8x8xf32> -> vector<8x8xf32>
    %cst_21 = arith.constant dense<0xFF800000> : vector<8xf32>
    %54 = vector.multi_reduction <maximumf>, %53, %cst_21 [1] : vector<8x8xf32> to vector<8xf32>
    %55 = vector.shape_cast %54 : vector<8xf32> to vector<8x1xf32>
    %56 = vector.broadcast %55 : vector<8x1xf32> to vector<8x8xf32>
    %57 = arith.subf %53, %56 : vector<8x8xf32>
    %58 = math.exp %57 : vector<8x8xf32>
    %cst_22 = arith.constant dense<0.000000e+00> : vector<8xf32>
    %59 = vector.multi_reduction <add>, %58, %cst_22 [1] : vector<8x8xf32> to vector<8xf32>
    %60 = vector.shape_cast %59 : vector<8xf32> to vector<8x1xf32>
    %61 = tpu.reciprocal %60 {approx = true} : vector<8x1xf32> -> vector<8x1xf32>
    %62 = arith.mulf %60, %61 : vector<8x1xf32>
    %cst_23 = arith.constant 2.000000e+00 : f32
    %63 = vector.broadcast %cst_23 : f32 to vector<8x1xf32>
    %64 = arith.subf %63, %62 : vector<8x1xf32>
    %65 = arith.mulf %61, %64 : vector<8x1xf32>
    %66 = vector.broadcast %65 : vector<8x1xf32> to vector<8x8xf32>
    %67 = arith.mulf %58, %66 : vector<8x8xf32>
    %cst_24 = arith.constant dense<0.000000e+00> : vector<8x8xf32>
    %68 = tpu.matmul %67, %52, %cst_24 {dimension_numbers = #tpu.dot_dimension_numbers<[1], [0], [0], [1], [0, 0, 1, 1], [], []>} : vector<8x8xf32>, vector<8x8xf32>, vector<8x8xf32> -> vector<8x8xf32>
    %69 = vector.extract_strided_slice %11 {offsets = [0, 24], sizes = [8, 8], strides = [1, 1]} : vector<16x128xf32> to vector<8x8xf32>
    %70 = vector.extract_strided_slice %11 {offsets = [0, 56], sizes = [8, 8], strides = [1, 1]} : vector<16x128xf32> to vector<8x8xf32>
    %71 = vector.extract_strided_slice %11 {offsets = [8, 88], sizes = [8, 8], strides = [1, 1]} : vector<16x128xf32> to vector<8x8xf32>
    %cst_25 = arith.constant dense<0.000000e+00> : vector<8x8xf32>
    %72 = tpu.matmul %69, %70, %cst_25 {dimension_numbers = #tpu.dot_dimension_numbers<[1], [1], [0], [0], [0, 0, 1, 0], [], []>} : vector<8x8xf32>, vector<8x8xf32>, vector<8x8xf32> -> vector<8x8xf32>
    %cst_26 = arith.constant dense<0xFF800000> : vector<8xf32>
    %73 = vector.multi_reduction <maximumf>, %72, %cst_26 [1] : vector<8x8xf32> to vector<8xf32>
    %74 = vector.shape_cast %73 : vector<8xf32> to vector<8x1xf32>
    %75 = vector.broadcast %74 : vector<8x1xf32> to vector<8x8xf32>
    %76 = arith.subf %72, %75 : vector<8x8xf32>
    %77 = math.exp %76 : vector<8x8xf32>
    %cst_27 = arith.constant dense<0.000000e+00> : vector<8xf32>
    %78 = vector.multi_reduction <add>, %77, %cst_27 [1] : vector<8x8xf32> to vector<8xf32>
    %79 = vector.shape_cast %78 : vector<8xf32> to vector<8x1xf32>
    %80 = tpu.reciprocal %79 {approx = true} : vector<8x1xf32> -> vector<8x1xf32>
    %81 = arith.mulf %79, %80 : vector<8x1xf32>
    %cst_28 = arith.constant 2.000000e+00 : f32
    %82 = vector.broadcast %cst_28 : f32 to vector<8x1xf32>
    %83 = arith.subf %82, %81 : vector<8x1xf32>
    %84 = arith.mulf %80, %83 : vector<8x1xf32>
    %85 = vector.broadcast %84 : vector<8x1xf32> to vector<8x8xf32>
    %86 = arith.mulf %77, %85 : vector<8x8xf32>
    %cst_29 = arith.constant dense<0.000000e+00> : vector<8x8xf32>
    %87 = tpu.matmul %86, %71, %cst_29 {dimension_numbers = #tpu.dot_dimension_numbers<[1], [0], [0], [1], [0, 0, 1, 1], [], []>} : vector<8x8xf32>, vector<8x8xf32>, vector<8x8xf32> -> vector<8x8xf32>
    %88 = tpu.concatenate %30, %49, %68, %87 in 1 : vector<8x8xf32>, vector<8x8xf32>, vector<8x8xf32>, vector<8x8xf32> -> vector<8x32xf32>
    %89 = vector.extract_strided_slice %3 {offsets = [0, 0], sizes = [32, 32], strides = [1, 1]} : vector<64x128xf32> to vector<32x32xf32>
    %cst_30 = arith.constant dense<0.000000e+00> : vector<8x32xf32>
    %90 = tpu.matmul %88, %89, %cst_30 {dimension_numbers = #tpu.dot_dimension_numbers<[1], [0], [0], [1], [0, 0, 1, 1], [], []>} : vector<8x32xf32>, vector<32x32xf32>, vector<8x32xf32> -> vector<8x32xf32>
    %91 = vector.extract_strided_slice %4 {offsets = [1, 0], sizes = [1, 32], strides = [1, 1]} : vector<8x128xf32> to vector<1x32xf32>
    %92 = vector.broadcast %91 : vector<1x32xf32> to vector<8x32xf32>
    %93 = arith.addf %90, %92 : vector<8x32xf32>
    %94 = arith.addf %1, %93 : vector<8x32xf32>
    %95 = vector.extract_strided_slice %4 {offsets = [4, 0], sizes = [1, 32], strides = [1, 1]} : vector<8x128xf32> to vector<1x32xf32>
    %96 = vector.extract_strided_slice %4 {offsets = [5, 0], sizes = [1, 32], strides = [1, 1]} : vector<8x128xf32> to vector<1x32xf32>
    %cst_31 = arith.constant dense<0.000000e+00> : vector<8xf32>
    %97 = vector.multi_reduction <add>, %94, %cst_31 [1] : vector<8x32xf32> to vector<8xf32>
    %98 = vector.shape_cast %97 : vector<8xf32> to vector<8x1xf32>
    %cst_32 = arith.constant 3.200000e+01 : f32
    %99 = vector.broadcast %cst_32 : f32 to vector<8x1xf32>
    %100 = arith.divf %98, %99 : vector<8x1xf32>
    %101 = vector.broadcast %100 : vector<8x1xf32> to vector<8x32xf32>
    %102 = arith.subf %94, %101 : vector<8x32xf32>
    %103 = arith.mulf %102, %102 : vector<8x32xf32>
    %cst_33 = arith.constant dense<0.000000e+00> : vector<8xf32>
    %104 = vector.multi_reduction <add>, %103, %cst_33 [1] : vector<8x32xf32> to vector<8xf32>
    %105 = vector.shape_cast %104 : vector<8xf32> to vector<8x1xf32>
    %cst_34 = arith.constant 3.200000e+01 : f32
    %106 = vector.broadcast %cst_34 : f32 to vector<8x1xf32>
    %107 = arith.divf %105, %106 : vector<8x1xf32>
    %108 = vector.broadcast %100 : vector<8x1xf32> to vector<8x32xf32>
    %109 = arith.subf %94, %108 : vector<8x32xf32>
    %cst_35 = arith.constant 9.99999974E-6 : f32
    %110 = vector.broadcast %cst_35 : f32 to vector<8x1xf32>
    %111 = arith.addf %107, %110 : vector<8x1xf32>
    %112 = math.rsqrt %111 : vector<8x1xf32>
    %113 = vector.broadcast %112 : vector<8x1xf32> to vector<8x32xf32>
    %114 = arith.mulf %109, %113 : vector<8x32xf32>
    %115 = vector.broadcast %95 : vector<1x32xf32> to vector<8x32xf32>
    %116 = arith.mulf %114, %115 : vector<8x32xf32>
    %117 = vector.broadcast %96 : vector<1x32xf32> to vector<8x32xf32>
    %118 = arith.addf %116, %117 : vector<8x32xf32>
    %119 = vector.extract_strided_slice %3 {offsets = [0, 32], sizes = [32, 64], strides = [1, 1]} : vector<64x128xf32> to vector<32x64xf32>
    %cst_36 = arith.constant dense<0.000000e+00> : vector<8x64xf32>
    %120 = tpu.matmul %118, %119, %cst_36 {dimension_numbers = #tpu.dot_dimension_numbers<[1], [0], [0], [1], [0, 0, 1, 1], [], []>} : vector<8x32xf32>, vector<32x64xf32>, vector<8x64xf32> -> vector<8x64xf32>
    %121 = vector.extract_strided_slice %4 {offsets = [2, 0], sizes = [1, 64], strides = [1, 1]} : vector<8x128xf32> to vector<1x64xf32>
    %122 = vector.broadcast %121 : vector<1x64xf32> to vector<8x64xf32>
    %123 = arith.addf %120, %122 : vector<8x64xf32>
    %cst_37 = arith.constant 0.000000e+00 : f32
    %124 = vector.broadcast %cst_37 : f32 to vector<8x64xf32>
    %125 = arith.maximumf %123, %124 : vector<8x64xf32>
    %126 = vector.extract_strided_slice %3 {offsets = [0, 96], sizes = [64, 32], strides = [1, 1]} : vector<64x128xf32> to vector<64x32xf32>
    %cst_38 = arith.constant dense<0.000000e+00> : vector<8x32xf32>
    %127 = tpu.matmul %125, %126, %cst_38 {dimension_numbers = #tpu.dot_dimension_numbers<[1], [0], [0], [1], [0, 0, 1, 1], [], []>} : vector<8x64xf32>, vector<64x32xf32>, vector<8x32xf32> -> vector<8x32xf32>
    %128 = vector.extract_strided_slice %4 {offsets = [3, 0], sizes = [1, 32], strides = [1, 1]} : vector<8x128xf32> to vector<1x32xf32>
    %129 = vector.broadcast %128 : vector<1x32xf32> to vector<8x32xf32>
    %130 = arith.addf %127, %129 : vector<8x32xf32>
    %131 = arith.addf %118, %130 : vector<8x32xf32>
    %132 = vector.extract_strided_slice %4 {offsets = [6, 0], sizes = [1, 32], strides = [1, 1]} : vector<8x128xf32> to vector<1x32xf32>
    %133 = vector.extract_strided_slice %4 {offsets = [7, 0], sizes = [1, 32], strides = [1, 1]} : vector<8x128xf32> to vector<1x32xf32>
    %cst_39 = arith.constant dense<0.000000e+00> : vector<8xf32>
    %134 = vector.multi_reduction <add>, %131, %cst_39 [1] : vector<8x32xf32> to vector<8xf32>
    %135 = vector.shape_cast %134 : vector<8xf32> to vector<8x1xf32>
    %cst_40 = arith.constant 3.200000e+01 : f32
    %136 = vector.broadcast %cst_40 : f32 to vector<8x1xf32>
    %137 = arith.divf %135, %136 : vector<8x1xf32>
    %138 = vector.broadcast %137 : vector<8x1xf32> to vector<8x32xf32>
    %139 = arith.subf %131, %138 : vector<8x32xf32>
    %140 = arith.mulf %139, %139 : vector<8x32xf32>
    %cst_41 = arith.constant dense<0.000000e+00> : vector<8xf32>
    %141 = vector.multi_reduction <add>, %140, %cst_41 [1] : vector<8x32xf32> to vector<8xf32>
    %142 = vector.shape_cast %141 : vector<8xf32> to vector<8x1xf32>
    %cst_42 = arith.constant 3.200000e+01 : f32
    %143 = vector.broadcast %cst_42 : f32 to vector<8x1xf32>
    %144 = arith.divf %142, %143 : vector<8x1xf32>
    %145 = vector.broadcast %137 : vector<8x1xf32> to vector<8x32xf32>
    %146 = arith.subf %131, %145 : vector<8x32xf32>
    %cst_43 = arith.constant 9.99999974E-6 : f32
    %147 = vector.broadcast %cst_43 : f32 to vector<8x1xf32>
    %148 = arith.addf %144, %147 : vector<8x1xf32>
    %149 = math.rsqrt %148 : vector<8x1xf32>
    %150 = vector.broadcast %149 : vector<8x1xf32> to vector<8x32xf32>
    %151 = arith.mulf %146, %150 : vector<8x32xf32>
    %152 = vector.broadcast %132 : vector<1x32xf32> to vector<8x32xf32>
    %153 = arith.mulf %151, %152 : vector<8x32xf32>
    %154 = vector.broadcast %133 : vector<1x32xf32> to vector<8x32xf32>
    %155 = arith.addf %153, %154 : vector<8x32xf32>
    %c0_44 = arith.constant 0 : index
    %c0_45 = arith.constant 0 : index
    %c0_46 = arith.constant 0 : index
    %156 = vector.load %arg6[%c0_44, %c0_45, %c0_46] : memref<1x8x32xf32, #tpu.memory_space<vmem>>, vector<1x8x32xf32>
    %157 = vector.shape_cast %156 : vector<1x8x32xf32> to vector<8x32xf32>
    %158 = vector.shape_cast %155 : vector<8x32xf32> to vector<1x8x32xf32>
    tpu.vector_store %arg6[%c0_44, %c0_45, %c0_46], %158 {strides = array<i32>} : memref<1x8x32xf32, #tpu.memory_space<vmem>>, vector<1x8x32xf32>,
    return
  }
  func.func @transform_0(%arg0: i32) -> (i32, i32, i32) {
    %c0_i32 = arith.constant 0 : i32
    %c0_i32_0 = arith.constant 0 : i32
    %c0_i32_1 = arith.constant 0 : i32
    return %arg0, %c0_i32, %c0_i32_0 : i32, i32, i32
  }
  func.func @transform_1(%arg0: i32) -> (i32, i32) {
    %c0_i32 = arith.constant 0 : i32
    %c0_i32_0 = arith.constant 0 : i32
    %c0_i32_1 = arith.constant 0 : i32
    return %c0_i32, %c0_i32_0 : i32, i32
  }
  func.func @transform_2(%arg0: i32) -> (i32, i32) {
    %c0_i32 = arith.constant 0 : i32
    %c0_i32_0 = arith.constant 0 : i32
    %c0_i32_1 = arith.constant 0 : i32
    return %c0_i32, %c0_i32_0 : i32, i32
  }
  func.func @transform_3(%arg0: i32) -> (i32, i32) {
    %c0_i32 = arith.constant 0 : i32
    %c0_i32_0 = arith.constant 0 : i32
    %c0_i32_1 = arith.constant 0 : i32
    return %c0_i32, %c0_i32_0 : i32, i32
  }
  func.func @transform_4(%arg0: i32) -> (i32, i32) {
    %c0_i32 = arith.constant 0 : i32
    %c0_i32_0 = arith.constant 0 : i32
    %c0_i32_1 = arith.constant 0 : i32
    return %c0_i32, %c0_i32_0 : i32, i32
  }
  func.func @transform_5(%arg0: i32) -> (i32, i32, i32) {
    %c0_i32 = arith.constant 0 : i32
    %c0_i32_0 = arith.constant 0 : i32
    %c0_i32_1 = arith.constant 0 : i32
    return %arg0, %c0_i32, %c0_i32_0 : i32, i32, i32
  }
}

</mosaic_0001>

<bundles_post_ra>
// kernel: tpu_custom_call.1
= control target key start
LH: loop header
LB: loop body
LE: loop exit
PB: predicated region body
PF: predicated region fallthrough
CT: control target
= control target key end

     0   :  { %10 = vsyncpa [#allocation3], 0  ;;  %s2462_s0 = inlined_call_operand.hbm [shape: f32[2,8,32], index: 0, kind: input, shape index: {}]   ;;  %s2463_s1 = inlined_call_operand.hbm [shape: f32[8,32], index: 1, kind: input, shape index: {}]   ;;  %s2464_s2 = inlined_call_operand.hbm [shape: f32[32,128], index: 2, kind: input, shape index: {}]   ;;  %s2465_s3 = inlined_call_operand.hbm [shape: f32[64,128], index: 3, kind: input, shape index: {}]   ;;  %s2466_s4 = inlined_call_operand.vmem [shape: f32[8,128], index: 4, kind: input, shape index: {}]   ;;  %s2467_s5 = inlined_call_operand.hbm [shape: f32[2,8,32], index: 5, kind: output, shape index: {}]  }
   0x1   :  { %12 = vsyncpa [#allocation3 + $0x1], 0 }
   0x2   :  { %13 = vsyncpa [#allocation6], 0 }
   0x3   :  { %14 = vsyncpa [#allocation9], 0 }
   0x4   :  { %15 = vsyncpa [#allocation4], 0 }
   0x5   :  { %17 = vsyncpa [#allocation4 + $0x1], 0  ;;  %s2106_s18 = smov 0   ;;  %s2108_s19 = smov 0  }
   0x6   :  { %s2110_s20 = smov 0   ;;  %s2112_s21 = smov 0  }
   0x7 LB: > { %s2127_s22 = sadd.s32 4294967295, %s2049_s21   ;;  %s1514_s23 = sadd.s32 4294967294, %s2049_s21   ;;  %s2049_s21 = sphi %s2112_s21, %s2490_s21   ;;  %s2045_s20 = sphi %s2110_s20, %s2489_s20   ;;  %s2041_s19 = sphi %s2108_s19, %s2488_s19   ;;  %s2037_s18 = sphi %s2106_s18, %s2487_s18  }
   0x8   : > { %p43_p0 = scmp.ne.s32.totalorder %s2041_s19, %s2037_s18  ;;  %p2468_p1 = scmp.eq.s32.totalorder %s2127_s22, 0 }
   0x9   : > { %p157_p3 = scmp.eq.s32.totalorder %s1514_s23, 1  ;;  %p1515_p5 = scmp.ge.s32.totalorder %s2049_s21, 1 }
   0xa   : > { %p2136_p4 = por %p2468_p1, %p43_p0  ;;  %p164_p7 = scmp.lt.s32.totalorder %s2049_s21, 3 }
   0xb   : > { %p2141_p6 = por %p157_p3, %p43_p0  ;;  %s2051_s27 = smov [#allocation5]  }
   0xc   : > { %s2471_s24 = scalar_select %p2136_p4, 1, 0 }
   0xd   : > { %s2472_s25 = scalar_select %p2141_p6, 1, 0 }
   0xe   : > { %p2146_p8 = pnand %p1515_p5, %p164_p7  ;;  %s177_s28 = sshll.u32 %s2051_s27, 4  ;;  %s178_s28 = int_to_ptr.vmem [resolvable:$true] %s177_s28 }
   0xf   : > { %s2052_s29 = smov [#allocation7]   ;;  %s2053_s7 = smov [#allocation8]  }
  0x10   : > { %s2473_s26 = scalar_select %p2146_p8, 1, 0 }
  0x11   : > { %p1730_p10 = pneg %p2146_p8  ;;  %s187_s30 = sshll.u32 %s2052_s29, 4  ;;  %s2159_s30 = int_to_ptr.vmem [resolvable:$true] %s187_s30 }
  0x12   : > { %s2161_s8 = sshll.u32 %s2053_s7, 4  ;;  %s1861_s11 = scalar_lea.hbm %s2463_s1, 128  ;;  %s201_s8 = int_to_ptr.vmem [resolvable:$true] %s2161_s8 }
  0x13   : > { %p2155_p11 = pnand %p1730_p10, %p2468_p1  ;;  %p1862_p12 = scmp.ne.s32.totalorder %s2463_s1, %s1861_s11 }
  0x14   : > { %p1868_p5 = scmp.lt.u32.totalorder %s1861_s11, %s2463_s1 }
  0x15   : > { %p2171_p13 = pneg %p2155_p11 }
  0x17   : > { %p1864_p0 = pnand %p2171_p13, %p1862_p12 }
  0x19   : > { %p1865_p3 = pneg %p1864_p0 }
  0x1b   : > { %p1870_p7 = pnand %p1868_p5, %p1865_p3 }
  0x1d   : > { %1873 = shalt.err (!%p1870_p7)
}
  0x1e   : > { %s1874_s17 = scalar_lea.vmem %s178_s28, 128  ;;  %p1882_p2 = scmp.lt.s32.totalorder %s178_s28, %s178_s28 }
  0x1f   : > { %p1875_p10 = scmp.ne.s32.totalorder %s178_s28, %s1874_s17  ;;  %p1883_p6 = scmp.lt.s32.totalorder %s1874_s17, %s1874_s17 }
  0x21   : > { %p1877_p9 = pnand %p1875_p10, %p2171_p13  ;;  %p1884_p4 = por %p1883_p6, %p1882_p2 }
  0x23   : > { %p1878_p1 = pneg %p1877_p9 }
  0x25   : > { %p1885_p8 = pnand %p1884_p4, %p1878_p1 }
  0x27   : > { %1888 = shalt.err (!%p1885_p8)
}
  0x28   : > { %1733 = dma.hbm_to_vmem [thread:$0]  (!%p2155_p11), %s2463_s1, 128, %s178_s28, [#allocation6]  }
  0x29   : > { %s1889_s9 = scalar_lea.hbm %s2464_s2, 512 }
  0x2a   : > { %p1890_p9 = scmp.ne.s32.totalorder %s2464_s2, %s1889_s9  ;;  %p1896_p1 = scmp.lt.u32.totalorder %s1889_s9, %s2464_s2 }
  0x2c   : > { %p1892_p12 = pnand %p1890_p9, %p2171_p13 }
  0x2e   : > { %p1893_p2 = pneg %p1892_p12 }
  0x30   : > { %p1898_p4 = pnand %p1896_p1, %p1893_p2 }
  0x32   : > { %1901 = shalt.err (!%p1898_p4)
}
  0x33   : > { %s1902_s28 = scalar_lea.vmem %s2159_s30, 512  ;;  %p1910_p3 = scmp.lt.s32.totalorder %s2159_s30, %s2159_s30 }
  0x34   : > { %p1903_p6 = scmp.ne.s32.totalorder %s2159_s30, %s1902_s28  ;;  %p1911_p5 = scmp.lt.s32.totalorder %s1902_s28, %s1902_s28 }
  0x36   : > { %p1905_p8 = pnand %p1903_p6, %p2171_p13  ;;  %p1912_p7 = por %p1911_p5, %p1910_p3 }
  0x38   : > { %p1906_p0 = pneg %p1905_p8 }
  0x3a   : > { %p1913_p10 = pnand %p1912_p7, %p1906_p0 }
  0x3c   : > { %1916 = shalt.err (!%p1913_p10)
}
  0x3d   : > { %s2054_s15 = smov 128   ;;  %s2055_s16 = smov 8  }
  0x3e   : > { %1736 = dma.hbm_to_vmem [thread:$0]  (!%p2155_p11), %s2464_s2, 512, %s2159_s30, [#allocation6], %s2054_s15, %s2054_s15, %s2055_s16  }
  0x3f   : > { %s1917_s7 = scalar_lea.hbm %s2465_s3, 1024 }
  0x40   : > { %p1918_p9 = scmp.ne.s32.totalorder %s2465_s3, %s1917_s7  ;;  %p1924_p1 = scmp.lt.u32.totalorder %s1917_s7, %s2465_s3 }
  0x42   : > { %p1920_p12 = pnand %p1918_p9, %p2171_p13 }
  0x44   : > { %p1921_p2 = pneg %p1920_p12 }
  0x46   : > { %p1926_p4 = pnand %p1924_p1, %p1921_p2 }
  0x48   : > { %1929 = shalt.err (!%p1926_p4)
}
  0x49   : > { %s1930_s13 = scalar_lea.vmem %s201_s8, 1024  ;;  %p1938_p3 = scmp.lt.s32.totalorder %s201_s8, %s201_s8 }
  0x4a   : > { %p1931_p6 = scmp.ne.s32.totalorder %s201_s8, %s1930_s13  ;;  %p1939_p5 = scmp.lt.s32.totalorder %s1930_s13, %s1930_s13 }
  0x4c   : > { %p1933_p8 = pnand %p1931_p6, %p2171_p13  ;;  %p1940_p7 = por %p1939_p5, %p1938_p3 }
  0x4e   : > { %p1934_p0 = pneg %p1933_p8 }
  0x50   : > { %p1941_p10 = pnand %p1940_p7, %p1934_p0 }
  0x52   : > { %1944 = shalt.err (!%p1941_p10)
}
  0x53   : > { %1739 = dma.hbm_to_vmem [thread:$0]  (!%p2155_p11), %s2465_s3, 1024, %s201_s8, [#allocation9], %s2054_s15, %s2054_s15, %s2055_s16  }
  0x54   : > { %s2230_s14 = sadd.s32 1, %s2049_s21   ;;  %s30_s6 = sadd.s32 1, %s2045_s20 }
  0x55   : > { %s27_s17 = ssub.s32 %s2049_s21, %s2230_s14  ;;  %p37_p9 = scmp.ne.s32.totalorder %s2045_s20, %s2041_s19 }
  0x56   : > { %p28_p13 = scmp.eq.s32.totalorder %s27_s17, 0  ;;  %p38_p12 = scmp.eq.s32.totalorder %s2049_s21, 0 }
  0x57   : > { %p1751_p2 = scmp.lt.s32.totalorder %s2049_s21, 2  ;;  %p2476_p4 = scmp.eq.s32.totalorder %s2127_s22, 1 }
  0x58   : > { %s2240_s23 = scalar_select %p28_p13, %s2045_s20, %s30_s6  }
  0x59   : > { %p39_p1 = por %p38_p12, %p37_p9  ;;  %p2244_p6 = por %p2476_p4, %p37_p9 }
  0x5a   : > { %s217_s29 = sand.u32 1, %s2045_s20   ;;  %s1521_s7 = sshll.u32 %s2049_s21, 7 }
  0x5b   : > { %s1520_s8 = sshll.u32 %s217_s29, 3  ;;  %s2253_s9 = scalar_lea.hbm %s2462_s0, %s1521_s7 }
  0x5c   : > { %s221_s10 = scalar_lea.vmem [#allocation2], %s1520_s8  ;;  %p2255_p11 = pnand %p1751_p2, %p39_p1 }
  0x5d   : > { %s228_s11 = sshll.u32 %s221_s10, 4  ;;  %s218_s13 = scalar_lea.sflag [#allocation3], %s217_s29  ;;  %s2259_s11 = int_to_ptr.vmem [resolvable:$true] %s228_s11 }
  0x5e   : > { %s1945_s30 = scalar_lea.hbm %s2253_s9, 128  ;;  %p1947_p0 = pneg %p2255_p11 }
  0x5f   : > { %p1946_p8 = scmp.ne.s32.totalorder %s2253_s9, %s1945_s30  ;;  %s1950_s6 = scalar_lea.hbm %s2462_s0, 256 }
  0x60   : > { %p1951_p7 = scmp.lt.u32.totalorder %s2253_s9, %s2462_s0  ;;  %p1952_p10 = scmp.lt.u32.totalorder %s1950_s6, %s1945_s30 }
  0x61   : > { %p1948_p3 = pnand %p1947_p0, %p1946_p8  ;;  %p1954_p9 = scmp.lt.u32.totalorder %s1945_s30, %s2253_s9 }
  0x62   : > { %p1953_p13 = por %p1952_p10, %p1951_p7 }
  0x63   : > { %p1949_p5 = pneg %p1948_p3 }
  0x64   : > { %p1955_p12 = por %p1954_p9, %p1953_p13 }
  0x66   : > { %p1956_p2 = pnand %p1955_p12, %p1949_p5 }
  0x68   : > { %1959 = shalt.err (!%p1956_p2)
}
  0x69   : > { %s1960_s29 = scalar_lea.vmem %s2259_s11, 128  ;;  %s2056_s15 = smov [#allocation2]  }
  0x6a   : > { %p1961_p1 = scmp.ne.s32.totalorder %s2259_s11, %s1960_s29  ;;  %s1965_s16 = sshll.u32 %s2056_s15, 4  ;;  %s1966_s16 = int_to_ptr.vmem [resolvable:$false] %s1965_s16 }
  0x6b   : > { %s1967_s10 = scalar_lea.vmem %s1966_s16, 256  ;;  %p1968_p3 = scmp.lt.s32.totalorder %s2259_s11, %s1966_s16 }
  0x6c   : > { %p1963_p4 = pnand %p1961_p1, %p1947_p0  ;;  %p1969_p7 = scmp.lt.s32.totalorder %s1967_s10, %s1960_s29 }
  0x6e   : > { %p1964_p8 = pneg %p1963_p4  ;;  %p1970_p10 = por %p1969_p7, %p1968_p3 }
  0x70   : > { %p1971_p13 = pnand %p1970_p10, %p1964_p8 }
  0x72   : > { %1974 = shalt.err (!%p1971_p13)
}
  0x73   : > { %1743 = dma.hbm_to_vmem [thread:$0]  (!%p2255_p11), %s2253_s9, 128, %s2259_s11, %s218_s13  }
  0x74   : > { %p2479_p5 = scmp.ne.s32.totalorder %s2473_s26, 0 }
  0x75   : > { %s2289_s30 = sand.u32 (!%p2479_p5), 1, %s2041_s19   ;;  %p2480_p0 = scmp.ne.s32.totalorder (!%p2479_p5), %s2471_s24, 0 }
  0x76   : > { %237 = sbr.rel (%p2479_p5) target bundleno = 2682 (0xa7a), region = 40  ;;  %s1523_s28 = sshll.u32 (!%p2479_p5), %s2289_s30, 3 }
  0x77   : > { %s240_s17 = scalar_lea.sflag (!%p2479_p5), [#allocation3], %s2289_s30  ;;  %s243_s6 = scalar_lea.vmem (!%p2479_p5), [#allocation2], %s1523_s28 }
  0x7d   : > { %2020 = dma.done.wait (%p2480_p0), %s240_s17, 128  }
  0x7e   : > { %2022 = vsyncadd (%p2480_p0), %s240_s17, 4294967168  ;;  %p2481_p11 = scmp.eq.s32.totalorder %s2127_s22, 0 }
  0x80   : > { %2024 = dma.done.wait (%p2481_p11), [#allocation6], 640   ;;  %p2482_p9 = pmov %p2481_p11 }
  0x82   : > { %2026 = vsyncadd (%p2482_p9), [#allocation6], 4294966656  ;;  %p2483_p12 = pmov %p2482_p9 }
  0x83   : > { %p2484_p2 = pmov %p2482_p9 }
  0x84   : > { %2028 = dma.done.wait (%p2483_p12), [#allocation9], 1024  }
  0x85   : > { %2030 = vsyncadd (%p2484_p2), [#allocation9], 4294966272  ;;  %v294_v0 = vld [vmem:[#allocation7] sm:$0xff]  ;;  %v295_v1 = vld [vmem:[#allocation7 + $0x8] sm:$0xff]  ;;  %vm302_vm0 = vcmask 261120   ;;  %v2057_v9 = vmov 0.0   ;;  %v298_v10 = vlaneseq }
  0x86   : > { %v296_v2 = vld [vmem:[#allocation7 + $0x10] sm:$0xff]  ;;  %v1682_v3 = vpack.c.bf16 %v295_v1, %v294_v0  ;;  %v297_v4 = vld [vmem:[#allocation7 + $0x18] sm:$0xff]  ;;  %1611 = vmatprep.subr.mxu0 %v2057_v9  ;;  %vm2058_vm1 = vmmov 0   ;;  %v2325_v13 = vld [vmem:[%s2466_s4] sm:$0xff]  ;;  %s2059_s9 = smov 120   ;;  %s2060_s11 = smov 96  }
  0x87   : > { %v2307_v5 = vld [vmem:[%s243_s6] sm:$0xff]  ;;  %v283_v6 = vld [vmem:[#allocation5] sm:$0xff]  ;;  %v1686_v7 = vpack.c.bf16 %v297_v4, %v296_v2  ;;  %v2315_v11 = vshrl.u32 %v298_v10, 7  ;;  %1613 = vmatprep.mubr.msk.f32.mxu0 %vm2058_vm1, %v2057_v9  ;;  %s2061_s12 = smov 80   ;;  %s2062_s13 = smov 88   ;;  %vm387_vm2 = vcmask 64512  }
  0x88   : > { %v293_v8 = vadd.f32 %v283_v6, %v2307_v5  ;;  %1683 = vmatprep.subr.bf16.mxu1 %v1682_v3  ;;  %s2063_s7 = smov 72   ;;  %s2064_s8 = smov 112   ;;  %vm1070_vm3 = vcmask 130048   ;;  %vm1072_vm4 = vcmask 195584   ;;  %vm1302_vm5 = vcmask 523264  }
  0x89   : > { %1685 = vmatpush3.bf16.msra.mxu1 %v1682_v3  ;;  %v300_v12 = vsub.s32 0, %v2315_v11  ;;  %s2065_s29 = smov 104   ;;  %s2066_s15 = smov 56  }
  0x8a   : > { %1598 = vmatprep.mubr.msk.f32.mxu1 %vm302_vm0, %v293_v8  ;;  %1687 = vmatprep.subr.bf16.mxu1 %v1686_v7  ;;  %s2067_s16 = smov 64   ;;  %s2068_s10 = smov 40  }
  0x8b   : > { %v301_v14 = vrot.slane %v2325_v13, %v300_v12  ;;  %s2069_s17 = smov 48   ;;  %s2070_s6 = smov 8  }
  0x8c   : > { %s2072_s24 = smov 16   ;;  %s2073_s26 = smov 24  }
  0x8d   : > { %1689 = vmatpush3.bf16.msra.mxu1 %v1686_v7 }
  0x8e   : > { %1601 = vmatprep.subr.mxu1 %v2057_v9 }
  0x90   : > { %1599 = vmatmul.mubr.msk.f32.vlgmr.msra.gmra.mrb[0].mxu1 %vm302_vm0, %v2307_v5 }
  0x91   : > { %1603 = vmatprep.mubr.msk.f32.mxu1 %vm2058_vm1, %v2057_v9 }
 0x163   : > { %v1600_v15 = vpop.f32.mrb[0].mxu1 }
 0x164   : > { %v2328_v16 = vadd.f32 %v1600_v15, %v301_v14  ;;  %v375_v17 = vpop.f32.mrb[1].mxu1 }
 0x165   : > { %v376_v18 = vadd.f32 %v375_v17, %v301_v14 }
 0x167   : > { %553 = vrot.lane.b32.xlu1 %v376_v18, %s2059_s9  ;;  %385 = vrot.lane.b32.xlu0 %v376_v18, %s2060_s11  ;;  %s2074_s9 = smov 32  }
 0x16b   : > { %723 = vrot.lane.b32.xlu1 %v376_v18, %s2061_s12  ;;  %555 = vrot.lane.b32.xlu0 %v376_v18, %s2062_s13  ;;  %s281_s12 = scalar_lea.vmem [#allocation10], %s1523_s28 }
 0x16c   : > { %s1415_s13 = sshll.u32 %s281_s12, 4  ;;  %s2419_s13 = int_to_ptr.vmem [resolvable:$true] %s1415_s13 }
 0x16f   : > { %891 = vrot.lane.b32.xlu1 %v376_v18, %s2063_s7  ;;  %721 = vrot.lane.b32.xlu0 %v376_v18, %s2064_s8 }
 0x173   : > { %889 = vrot.lane.b32.xlu0 %v376_v18, %s2065_s29 }
 0x1d9   : > { %v554_v19 = vpop.permute.xlu1 %553  ;;  %v386_v20 = vpop.permute.xlu0 %385 }
 0x1da   : > { %1602 = vmatpush3.xpose.msk.msra.mxu1 %vm387_vm2, %v386_v20 }
 0x1db   : > { %1606 = vmatprep.subr.mxu1 %v2057_v9 }
 0x1dd   : > { %1604 = vmatmul.mubr.msk.f32.vlgmr.msra.gmra.mrb[2].mxu1 %vm387_vm2, %v376_v18  ;;  %v556_v21 = vpop.permute.xlu0 %555  ;;  %v724_v22 = vpop.permute.xlu1 %723 }
 0x1de   : > { %1612 = vmatpush3.xpose.msk.msra.mxu0 %vm387_vm2, %v556_v21  ;;  %1608 = vmatprep.mubr.msk.f32.mxu1 %vm2058_vm1, %v2057_v9 }
 0x1df   : > { %1621 = vmatprep.subr.mxu0 %v2057_v9 }
 0x1e1   : > { %1614 = vmatmul.mubr.msk.f32.vlgmr.msra.gmra.mrb[0].mxu0 %vm387_vm2, %v554_v19  ;;  %v722_v23 = vpop.permute.xlu0 %721  ;;  %v892_v24 = vpop.permute.xlu1 %891 }
 0x1e2   : > { %1622 = vmatpush3.xpose.msk.msra.mxu0 %vm387_vm2, %v724_v22  ;;  %1623 = vmatprep.mubr.msk.f32.mxu0 %vm2058_vm1, %v2057_v9 }
 0x1e3   : > { %1631 = vmatprep.subr.mxu0 %v2057_v9 }
 0x1e5   : > { %1624 = vmatmul.mubr.msk.f32.vlgmr.msra.gmra.mrb[2].mxu0 %vm387_vm2, %v722_v23  ;;  %v890_v25 = vpop.permute.xlu0 %889 }
 0x1e6   : > { %1632 = vmatpush3.xpose.msk.msra.mxu0 %vm387_vm2, %v892_v24  ;;  %1633 = vmatprep.mubr.msk.f32.mxu0 %vm2058_vm1, %v2057_v9 }
 0x1e9   : > { %1634 = vmatmul.mubr.msk.f32.vlgmr.msra.gmra.mrb[4].mxu0 %vm387_vm2, %v890_v25 }
 0x1ea   : > { %1649 = vmatprep.mubr.msk.f32.mxu0 %vm2058_vm1, %v2057_v9 }
 0x2b0   : > { %v458_v26 = vpop.f32.mrb[2].mxu1 }
 0x2b1   : > { %v1605_v27 = vpop.f32.mrb[3].mxu1  ;;  %v462_v28 = vsel %vm387_vm2, %v458_v26, -inf }
 0x2b2   : > { %463 = vmax.xlane.f32.xlu1 %v462_v28 }
 0x2b4   : > { %v627_v29 = vpop.f32.mrb[0].mxu0 }
 0x2b5   : > { %v1615_v30 = vpop.f32.mrb[1].mxu0  ;;  %v631_v31 = vsel %vm387_vm2, %v627_v29, -inf }
 0x2b6   : > { %632 = vmax.xlane.f32.xlu0 %v631_v31  ;;  %v284_v30 = vld [vmem:[#allocation8] sm:$0xff]  ;;  %v285_v31 = vld [vmem:[#allocation8 + $0x8] sm:$0xff] }
 0x2b8   : > { %v795_v32 = vpop.f32.mrb[2].mxu0 }
 0x2b9   : > { %v1625_v33 = vpop.f32.mrb[3].mxu0  ;;  %v799_v34 = vsel %vm387_vm2, %v795_v32, -inf }
 0x2ba   : > { %800 = vmax.xlane.f32.xlu0 %v799_v34  ;;  %v2071_v33 = vmov 0.0|0.0   ;;  %v1691_v34 = vpack.c.bf16 %v285_v31, %v284_v30 }
 0x2bb   : > { %1690 = vmatprep.subr.bf16.mxu0 %v2071_v33 }
 0x2bc   : > { %v963_v35 = vpop.f32.mrb[4].mxu0  ;;  %1692 = vmatpush3.bf16.msra.mxu0 %v1691_v34 }
 0x2bd   : > { %v1635_v36 = vpop.f32.mrb[5].mxu0  ;;  %v967_v37 = vsel %vm387_vm2, %v963_v35, -inf  ;;  %1693 = vmatprep.subr.bf16.mxu0 %v2071_v33 }
 0x2be   : > { %968 = vmax.xlane.f32.xlu1 %v967_v37 }
 0x33f   : > { %v464_v38 = vpop.xlane.xlu1 %463 }
 0x340   : > { %v465_v39 = vsub.f32 %v458_v26, %v464_v38 }
 0x342   : > { %v466_v40 = vmul.f32 1.442695, %v465_v39 }
 0x343   : > { %v633_v41 = vpop.xlane.xlu0 %632 }
 0x344   : > { %1841 = vpow2.f32 %v466_v40  ;;  %v634_v42 = vsub.f32 %v627_v29, %v633_v41 }
 0x346   : > { %v635_v43 = vmul.f32 1.442695, %v634_v42 }
 0x347   : > { %v801_v44 = vpop.xlane.xlu0 %800 }
 0x348   : > { %1843 = vpow2.f32 %v635_v43  ;;  %v802_v45 = vsub.f32 %v795_v32, %v801_v44  ;;  %v286_v32 = vld [vmem:[#allocation8 + $0x10] sm:$0xff] }
 0x34a   : > { %v803_v46 = vmul.f32 1.442695, %v802_v45 }
 0x34b   : > { %v969_v53 = vpop.xlane.xlu1 %968 }
 0x34c   : > { %1845 = vpow2.f32 %v803_v46  ;;  %v970_v54 = vsub.f32 %v963_v35, %v969_v53  ;;  %v287_v35 = vld [vmem:[#allocation8 + $0x18] sm:$0xff] }
 0x34d   : > { %v1694_v36 = vpack.c.bf16 %v287_v35, %v286_v32 }
 0x34e   : > { %v1842_v47 = vpop.eup %1841  ;;  %v971_v55 = vmul.f32 1.442695, %v970_v54  ;;  %v1811_v54 = vpack.i.bf16 %v285_v31, %v284_v30 }
 0x34f   : > { %v468_v48 = vsel %vm387_vm2, %v1842_v47, 0.0  ;;  %1695 = vmatpush3.bf16.msra.mxu0 %v1694_v36 }
 0x350   : > { %469 = vadd.xlane.f32.xlu0 %v468_v48  ;;  %1847 = vpow2.f32 %v971_v55  ;;  %1702 = vmatprep.subr.bf16.mxu0 %v2071_v33 }
 0x352   : > { %v1844_v49 = vpop.eup %1843 }
 0x353   : > { %v637_v50 = vsel %vm387_vm2, %v1844_v49, 0.0 }
 0x354   : > { %638 = vadd.xlane.f32.xlu1 %v637_v50 }
 0x356   : > { %v1846_v51 = vpop.eup %1845 }
 0x357   : > { %v805_v52 = vsel %vm387_vm2, %v1846_v51, 0.0 }
 0x358   : > { %806 = vadd.xlane.f32.xlu0 %v805_v52 }
 0x35a   : > { %v1848_v56 = vpop.eup %1847 }
 0x35b   : > { %v973_v57 = vsel %vm387_vm2, %v1848_v56, 0.0 }
 0x365   : > { %645 = vrot.lane.b32.xlu1 %v2328_v16, %s2066_s15  ;;  %s1402_s15 = scalar_lea.sflag [#allocation4], %s2289_s30 }
 0x36e   : > { %477 = vrot.lane.b32.xlu0 %v2328_v16, %s2067_s16  ;;  %s1975_s16 = scalar_lea.vmem %s2419_s13, 128 }
 0x36f   : > { %p1976_p1 = scmp.ne.s32.totalorder %s2419_s13, %s1975_s16 }
 0x371   : > { %p1977_p4 = pnand %p1976_p1, %p2244_p6 }
 0x372   : > { %981 = vrot.lane.b32.xlu0 %v2328_v16, %s2068_s10 }
 0x373   : > { %p1978_p8 = pneg %p1977_p4 }
 0x389   : > { %974 = vadd.xlane.f32.xlu1 %v973_v57 }
 0x39a   : > { %813 = vrot.lane.b32.xlu1 %v2328_v16, %s2069_s17 }
 0x3dd   : > { %v470_v58 = vpop.xlane.xlu0 %469 }
 0x3de   : > { %1849 = vrcp.f32 %v470_v58 }
 0x3e1   : > { %v639_v59 = vpop.xlane.xlu1 %638 }
 0x3e2   : > { %1851 = vrcp.f32 %v639_v59 }
 0x3e5   : > { %v807_v60 = vpop.xlane.xlu0 %806  ;;  %v646_v8 = vpop.permute.xlu1 %645 }
 0x3e6   : > { %1853 = vrcp.f32 %v807_v60 }
 0x3e8   : > { %v1850_v61 = vpop.eup %1849 }
 0x3e9   : > { %v472_v62 = vmul.f32 %v1850_v61, %v470_v58  ;;  %v478_v63 = vpop.permute.xlu0 %477 }
 0x3ea   : > { %1607 = vmatpush3.msra.mxu1 %v478_v63  ;;  %v288_v63 = vld [vmem:[#allocation8 + $0x20] sm:$0xff] }
 0x3eb   : > { %v473_v0 = vsub.f32 2.0, %v472_v62  ;;  %1616 = vmatprep.subr.mxu1 %v2057_v9 }
 0x3ec   : > { %v1852_v1 = vpop.eup %1851 }
 0x3ed   : > { %v474_v2 = vmul.f32 %v1850_v61, %v473_v0  ;;  %v641_v3 = vmul.f32 %v1852_v1, %v639_v59  ;;  %v982_v20 = vpop.permute.xlu0 %981  ;;  %v1816_v59 = vpack.i.bf16 %v287_v35, %v286_v32  ;;  %v289_v0 = vld [vmem:[#allocation8 + $0x28] sm:$0xff] }
 0x3ef   : > { %v475_v4 = vmul.f32 %v1842_v47, %v474_v2  ;;  %v642_v6 = vsub.f32 2.0, %v641_v3  ;;  %v1076_v47 = vsub.s32 1, %v2315_v11  ;;  %v291_v2 = vld [vmem:[#allocation8 + $0x38] sm:$0xff]  ;;  %v1831_v3 = vpack.i.bf16 %v289_v0, %v288_v63 }
 0x3f0   : > { %v1854_v12 = vpop.eup %1853 }
 0x3f1   : > { %v643_v7 = vmul.f32 %v1852_v1, %v642_v6  ;;  %1609 = vmatmul.mubr.msk.f32.vlgmr.msra.gmra.mrb[4].mxu1 %vm387_vm2, %v475_v4  ;;  %v809_v14 = vmul.f32 %v1854_v12, %v807_v60  ;;  %v1077_v48 = vrot.slane %v2325_v13, %v1076_v47  ;;  %v290_v1 = vld [vmem:[#allocation8 + $0x30] sm:$0xff]  ;;  %v1272_v47 = vsub.s32 3, %v2315_v11 }
 0x3f2   : > { %1617 = vmatpush3.msra.mxu1 %v646_v8  ;;  %1618 = vmatprep.mubr.msk.f32.mxu1 %vm2058_vm1, %v2057_v9  ;;  %v1836_v4 = vpack.i.bf16 %v291_v2, %v290_v1 }
 0x3f3   : > { %v644_v10 = vmul.f32 %v1844_v49, %v643_v7  ;;  %1626 = vmatprep.subr.mxu1 %v2057_v9  ;;  %v810_v15 = vsub.f32 2.0, %v809_v14 }
 0x3f5   : > { %1619 = vmatmul.mubr.msk.f32.vlgmr.msra.gmra.mrb[6].mxu1 %vm387_vm2, %v644_v10  ;;  %v811_v16 = vmul.f32 %v1854_v12, %v810_v15 }
 0x3f6   : > { %1628 = vmatprep.mubr.msk.f32.mxu1 %vm2058_vm1, %v2057_v9 }
 0x3f7   : > { %v812_v18 = vmul.f32 %v1846_v51, %v811_v16  ;;  %v1168_v16 = vsub.s32 4, %v2315_v11 }
 0x416   : > { %v975_v17 = vpop.xlane.xlu1 %974 }
 0x417   : > { %1855 = vrcp.f32 %v975_v17 }
 0x41a   : > { %v814_v19 = vpop.permute.xlu1 %813 }
 0x41b   : > { %1627 = vmatpush3.msra.mxu1 %v814_v19 }
 0x41c   : > { %1629 = vmatmul.mubr.msk.f32.vlgmr.msra.gmra.mrb[8].mxu1 %vm387_vm2, %v812_v18  ;;  %1636 = vmatprep.subr.mxu1 %v2057_v9 }
 0x41d   : > { %1637 = vmatpush3.msra.mxu1 %v982_v20  ;;  %1638 = vmatprep.mubr.msk.f32.mxu1 %vm2058_vm1, %v2057_v9 }
 0x41e   : > { %1696 = vmatprep.subr.bf16.mxu1 %v2071_v33 }
 0x421   : > { %v1856_v21 = vpop.eup %1855 }
 0x422   : > { %v977_v22 = vmul.f32 %v1856_v21, %v975_v17 }
 0x424   : > { %v978_v23 = vsub.f32 2.0, %v977_v22 }
 0x426   : > { %v979_v24 = vmul.f32 %v1856_v21, %v978_v23  ;;  %v1173_v23 = vsub.s32 5, %v2315_v11 }
 0x428   : > { %v980_v25 = vmul.f32 %v1848_v56, %v979_v24  ;;  %v1174_v32 = vrot.slane %v2325_v13, %v1173_v23 }
 0x42a   : > { %1639 = vmatmul.mubr.msk.f32.vlgmr.msra.gmra.mrb[10].mxu1 %vm387_vm2, %v980_v25  ;;  %v1169_v25 = vrot.slane %v2325_v13, %v1168_v16 }
 0x42b   : > { %1660 = vmatprep.mubr.msk.f32.mxu1 %vm2058_vm1, %v2057_v9 }
 0x4c4   : > { %v549_v26 = vpop.f32.mrb[4].mxu1 }
 0x4c5   : > { %v1610_v27 = vpop.f32.mrb[5].mxu1 }
 0x4c8   : > { %v717_v28 = vpop.f32.mrb[6].mxu1 }
 0x4c9   : > { %1058 = vrot.lane.b32.xlu1 %v717_v28, %s2070_s6  ;;  %v1620_v29 = vpop.f32.mrb[7].mxu1 }
 0x4ef   : > { %v885_v37 = vpop.f32.mrb[8].mxu1 }
 0x4f0   : > { %1062 = vrot.lane.b32.xlu0 %v885_v37, %s2072_s24  ;;  %v1630_v38 = vpop.f32.mrb[9].mxu1 }
 0x4fd   : > { %v1053_v39 = vpop.f32.mrb[10].mxu1 }
 0x4fe   : > { %1066 = vrot.lane.b32.xlu1 %v1053_v39, %s2073_s26  ;;  %v1640_v40 = vpop.f32.mrb[11].mxu1 }
 0x53b   : > { %v1059_v41 = vpop.permute.xlu1 %1058 }
 0x53c   : > { %v1069_v43 = vsel %vm387_vm2, %v549_v26, %v1059_v41  ;;  %v1178_v41 = vsub.s32 2, %v2315_v11 }
 0x562   : > { %v1063_v42 = vpop.permute.xlu0 %1062 }
 0x563   : > { %v1071_v44 = vsel %vm1070_vm3, %v1069_v43, %v1063_v42  ;;  %v1179_v42 = vrot.slane %v2325_v13, %v1178_v41 }
 0x570   : > { %v1067_v45 = vpop.permute.xlu1 %1066 }
 0x571   : > { %v1073_v46 = vsel %vm1072_vm4, %v1071_v44, %v1067_v45 }
 0x572   : > { %1650 = vmatmul.mubr.msk.f32.vlgmr.msra.gmra.mrb[6].mxu0 %vm302_vm0, %v1073_v46 }
 0x573   : > { %1679 = vmatprep.mubr.msk.f32.mxu0 %vm2058_vm1, %v2057_v9 }
 0x645   : > { %v1147_v49 = vpop.f32.mrb[6].mxu0 }
 0x646   : > { %v1148_v50 = vadd.f32 %v1147_v49, %v1077_v48  ;;  %v1651_v51 = vpop.f32.mrb[7].mxu0  ;;  %v1273_v48 = vrot.slane %v2325_v13, %v1272_v47 }
 0x648   : > { %v1151_v52 = vadd.f32 %v1148_v50, %v2307_v5 }
 0x64a   : > { %v1152_v53 = vsel %vm302_vm0, %v1151_v52, 0.0 }
 0x64b   : > { %1153 = vadd.xlane.f32.xlu0 %v1152_v53 }
 0x661   : > { %1812 = vrot.lane.b32.xlu0 %v1811_v54, %s2060_s11 }
 0x665   : > { %1822 = vrot.lane.b32.xlu0 %v1811_v54, %s2074_s9 }
 0x669   : > { %1832 = vrot.lane.b32.xlu0 %v1831_v3, %s2074_s9 }
 0x6d8   : > { %v1154_v55 = vpop.xlane.xlu0 %1153 }
 0x6d9   : > { %v1156_v56 = vmul.f32 0.03125, %v1154_v55 }
 0x6db   : > { %v1157_v57 = vsub.f32 %v1151_v52, %v1156_v56 }
 0x6dc   : > { %v1813_v60 = vpop.permute.xlu0 %1812 }
 0x6dd   : > { %v1158_v58 = vmul.f32 %v1157_v57, %v1157_v57  ;;  %v1815_v61 = vunpack.i.h.bf16 %v1813_v60  ;;  %v1814_v62 = vunpack.i.l.bf16 %v1813_v60  ;;  %v1392_v60 = vsub.s32 6, %v2315_v11 }
 0x6df   : > { %v1159_v9 = vsel %vm302_vm0, %v1158_v58, 0.0  ;;  %v1697_v5 = vpack.c.bf16 %v1815_v61, %v1814_v62  ;;  %v1397_v61 = vsub.s32 7, %v2315_v11  ;;  %v1393_v62 = vrot.slane %v2325_v13, %v1392_v60 }
 0x6e0   : > { %1160 = vadd.xlane.f32.xlu1 %v1159_v9  ;;  %v1823_v17 = vpop.permute.xlu0 %1822 }
 0x6e1   : > { %1698 = vmatpush3.bf16.msra.mxu1 %v1697_v5  ;;  %v1825_v19 = vunpack.i.h.bf16 %v1823_v17  ;;  %v1824_v20 = vunpack.i.l.bf16 %v1823_v17  ;;  %v1398_v0 = vrot.slane %v2325_v13, %v1397_v61 }
 0x6e2   : > { %1699 = vmatprep.subr.bf16.mxu1 %v2071_v33 }
 0x6e3   : > { %v1703_v24 = vpack.c.bf16 %v1825_v19, %v1824_v20 }
 0x6e4   : > { %v1833_v26 = vpop.permute.xlu0 %1832 }
 0x6e5   : > { %1704 = vmatpush3.bf16.msra.mxu0 %v1703_v24  ;;  %v1835_v29 = vunpack.i.h.bf16 %v1833_v26  ;;  %v1834_v30 = vunpack.i.l.bf16 %v1833_v26 }
 0x6e6   : > { %1705 = vmatprep.subr.bf16.mxu0 %v2071_v33 }
 0x6e7   : > { %v1709_v36 = vpack.c.bf16 %v1835_v29, %v1834_v30 }
 0x6f1   : > { %1817 = vrot.lane.b32.xlu1 %v1816_v59, %s2060_s11  ;;  %s1546_s11 = sshll.u32 %s2127_s22, 7  ;;  %s2075_s22 = smov [#allocation10]  }
 0x6f2   : > { %s2417_s29 = scalar_lea.hbm %s2467_s5, %s1546_s11  ;;  %s1979_s28 = sshll.u32 %s2075_s22, 4  ;;  %s1980_s28 = int_to_ptr.vmem [resolvable:$false] %s1979_s28 }
 0x6f3   : > { %s1981_s10 = scalar_lea.vmem %s1980_s28, 256  ;;  %p1982_p3 = scmp.lt.s32.totalorder %s2419_s13, %s1980_s28 }
 0x6f4   : > { %p1983_p7 = scmp.lt.s32.totalorder %s1981_s10, %s1975_s16 }
 0x6f5   : > { %1827 = vrot.lane.b32.xlu1 %v1816_v59, %s2074_s9 }
 0x6f6   : > { %p1984_p10 = por %p1983_p7, %p1982_p3 }
 0x6f8   : > { %p1985_p13 = pnand %p1984_p10, %p1978_p8 }
 0x6f9   : > { %1837 = vrot.lane.b32.xlu1 %v1836_v4, %s2074_s9 }
 0x76d   : > { %v1161_v6 = vpop.xlane.xlu1 %1160 }
 0x76e   : > { %v1162_v7 = vmul.f32 0.03125, %v1161_v6 }
 0x770   : > { %v1163_v8 = vadd.f32 1e-05, %v1162_v7 }
 0x771   : > { %v1818_v10 = vpop.permute.xlu1 %1817 }
 0x772   : > { %1857 = vrsqrt.f32 %v1163_v8  ;;  %v1820_v12 = vunpack.i.h.bf16 %v1818_v10  ;;  %v1819_v14 = vunpack.i.l.bf16 %v1818_v10 }
 0x774   : > { %v1700_v15 = vpack.c.bf16 %v1820_v12, %v1819_v14 }
 0x775   : > { %v1828_v18 = vpop.permute.xlu1 %1827 }
 0x776   : > { %1701 = vmatpush3.bf16.msra.mxu1 %v1700_v15  ;;  %v1830_v21 = vunpack.i.h.bf16 %v1828_v18  ;;  %v1829_v22 = vunpack.i.l.bf16 %v1828_v18 }
 0x778   : > { %v1706_v28 = vpack.c.bf16 %v1830_v21, %v1829_v22 }
 0x779   : > { %v1838_v34 = vpop.permute.xlu1 %1837 }
 0x77a   : > { %1707 = vmatpush3.bf16.msra.mxu0 %v1706_v28  ;;  %v1840_v37 = vunpack.i.h.bf16 %v1838_v34  ;;  %v1839_v38 = vunpack.i.l.bf16 %v1838_v34 }
 0x77b   : > { %1708 = vmatprep.subr.bf16.mxu0 %v2071_v33 }
 0x77c   : > { %v1858_v27 = vpop.eup %1857  ;;  %v1712_v40 = vpack.c.bf16 %v1840_v37, %v1839_v38 }
 0x77d   : > { %v1165_v31 = vmul.f32 %v1858_v27, %v1157_v57 }
 0x77e   : > { %1710 = vmatpush3.bf16.msra.mxu0 %v1709_v36 }
 0x77f   : > { %v1170_v35 = vmul.f32 %v1169_v25, %v1165_v31  ;;  %1711 = vmatprep.subr.bf16.mxu0 %v2071_v33 }
 0x781   : > { %v1175_v39 = vadd.f32 %v1174_v32, %v1170_v35 }
 0x782   : > { %1713 = vmatpush3.bf16.msra.mxu0 %v1712_v40 }
 0x783   : > { %1661 = vmatmul.mubr.msk.f32.vlgmr.msra.gmra.mrb[12].mxu1 %vm302_vm0, %v1175_v39 }
 0x856   : > { %v1265_v43 = vpop.f32.mrb[12].mxu1 }
 0x857   : > { %v1266_v44 = vadd.f32 %v1265_v43, %v1179_v42  ;;  %v1662_v45 = vpop.f32.mrb[13].mxu1 }
 0x859   : > { %v1269_v46 = vmax.f32 %v1266_v44, 0.0 }
 0x85b   : > { %1680 = vmatmul.mubr.msk.f32.vlgmr.msra.gmra.mrb[8].mxu0 %vm1302_vm5, %v1269_v46 }
 0x92e   : > { %v1372_v49 = vpop.f32.mrb[8].mxu0 }
 0x92f   : > { %v1373_v50 = vadd.f32 %v1372_v49, %v1273_v48  ;;  %v1681_v51 = vpop.f32.mrb[9].mxu0 }
 0x931   : > { %v1376_v52 = vadd.f32 %v1373_v50, %v1175_v39 }
 0x933   : > { %v1377_v33 = vsel %vm302_vm0, %v1376_v52, 0.0 }
 0x934   : > { %1378 = vadd.xlane.f32.xlu0 %v1377_v33 }
 0x9c1   : > { %v1379_v53 = vpop.xlane.xlu0 %1378 }
 0x9c2   : > { %v1380_v54 = vmul.f32 0.03125, %v1379_v53 }
 0x9c4   : > { %v1381_v55 = vsub.f32 %v1376_v52, %v1380_v54 }
 0x9c6   : > { %v1382_v56 = vmul.f32 %v1381_v55, %v1381_v55 }
 0x9c8   : > { %v1383_v57 = vsel %vm302_vm0, %v1382_v56, 0.0 }
 0x9c9   : > { %1384 = vadd.xlane.f32.xlu1 %v1383_v57 }
 0xa56   : > { %v1385_v58 = vpop.xlane.xlu1 %1384 }
 0xa57   : > { %v1386_v9 = vmul.f32 0.03125, %v1385_v58 }
 0xa59   : > { %v1387_v59 = vadd.f32 1e-05, %v1386_v9 }
 0xa5b   : > { %1859 = vrsqrt.f32 %v1387_v59 }
 0xa65   : > { %v1860_v5 = vpop.eup %1859 }
 0xa66   : > { %v1389_v63 = vmul.f32 %v1860_v5, %v1381_v55 }
 0xa68   : > { %v1394_v1 = vmul.f32 %v1393_v62, %v1389_v63 }
 0xa6a   : > { %v1399_v2 = vadd.f32 %v1398_v0, %v1394_v1 }
 0xa6c   : > { %1400 = vst.msk [vmem:[%s281_s12] sm:$0xff] %vm302_vm0, %v1399_v2 }
 0xa6d   : > { %1988 = shalt.err (!%p1985_p13)
}
 0xa6e   : > { %s1989_s30 = scalar_lea.hbm %s2417_s29, 128  ;;  %s1993_s24 = scalar_lea.hbm %s2467_s5, 256 }
 0xa6f   : > { %p1990_p5 = scmp.ne.s32.totalorder %s2417_s29, %s1989_s30  ;;  %p1994_p9 = scmp.lt.u32.totalorder %s2417_s29, %s2467_s5 }
 0xa70   : > { %p1995_p12 = scmp.lt.u32.totalorder %s1993_s24, %s1989_s30  ;;  %p1997_p1 = scmp.lt.u32.totalorder %s1989_s30, %s2417_s29 }
 0xa71   : > { %p1991_p0 = pnand %p1990_p5, %p2244_p6 }
 0xa72   : > { %p1996_p2 = por %p1995_p12, %p1994_p9 }
 0xa73   : > { %p1992_p11 = pneg %p1991_p0 }
 0xa74   : > { %p1998_p4 = por %p1997_p1, %p1996_p2 }
 0xa76   : > { %p1999_p8 = pnand %p1998_p4, %p1992_p11 }
 0xa78   : > { %2002 = shalt.err (!%p1999_p8)
}
 0xa79   : > { %1728 = dma.vmem_to_hbm [thread:$0]  (%p2244_p6), %s2419_s13, 128, %s2417_s29, %s1402_s15  }
 0xa7a PF: > { %s1427_s11 = sand.u32 1, %s2037_s18   ;;  %p2485_p3 = scmp.ne.s32.totalorder %s2472_s25, 0 }
 0xa7b   : > { %p2486_p7 = scmp.ge.s32.totalorder %s2049_s21, 2  ;;  %s1428_s12 = scalar_lea.sflag [#allocation4], %s1427_s11 }
 0xa7d   : > { %p1745_p10 = pnand %p2486_p7, %p2485_p3 }
 0xa7f   : > { %2032 = dma.done.wait (!%p1745_p10), %s1428_s12, 128  }
 0xa80   : > { %2034 = vsyncadd (!%p1745_p10), %s1428_s12, 4294967168  ;;  %p20_p13 = scmp.ge.s32.totalorder %s2230_s14, 4   ;;  %s2487_s18 = smov %s2041_s19 }
 0xa81   : > { %s2488_s19 = smov %s2045_s20  ;;  %s2489_s20 = smov %s2240_s23 }
 0xa82   : > { %s2490_s21 = smov %s2230_s14  ;;  %22 = sbr.rel (!%p20_p13) target bundleno = 7 (0x7), region = 97 }
 0xa89   :  { %1433 = vsyncpa [#allocation3], 1 }
 0xa8a   :  { %1435 = vsyncpa [#allocation3 + $0x1], 1 }
 0xa8b   :  { %1436 = vsyncpa [#allocation6], 1 }
 0xa8c   :  { %1437 = vsyncpa [#allocation9], 1 }
 0xa8d   :  { %1438 = vsyncpa [#allocation4], 1 }
 0xa8e   :  { %1440 = vsyncpa [#allocation4 + $0x1], 1 }

</bundles_post_ra>
